<compile_context>
chip_gen: v6e
topology: v6e:2x2x1
jax: 0.10.0
libtpu: 0.0.40
codegen_flags: <defaults>
</compile_context>

<pallas_src>
import functools
import math

import jax
import jax.numpy as jnp
from jax.experimental import pallas as pl
from jax.experimental.pallas import tpu as pltpu


_VMEM_LIMIT_BYTES = 32 * 1024 * 1024   # raise v5e's 16 MiB scoped default; <= physical on all chips


# --------------------------------------------------------------------------- #
# Tiling helpers
# --------------------------------------------------------------------------- #
def _sublane(dtype) -> int:
    """Sublane pack: 8 rows for 32-bit, 16 for 16-bit, 32 for 8-bit dtypes."""
    return 8 * max(1, 4 // jnp.dtype(dtype).itemsize)


def _round_up(n: int, m: int) -> int:
    return (n + m - 1) // m * m


def _pick_row_tile(rows: int, dim: int, itemsize: int, sub: int,
                   max_tile_bytes: int) -> int:
    """Largest row tile within the VMEM budget, but at least 2 grid steps when
    rows allow it (keeps both v7x TensorCores busy and the DMA pipeline on)."""
    cap = max(sub, (max_tile_bytes // max(1, dim * itemsize)) // sub * sub)
    if rows <= sub:
        return rows                       # full extent: always a legal block
    half = _round_up(pl.cdiv(rows, 2), sub)
    return max(sub, min(cap, half))


# --------------------------------------------------------------------------- #
# Kernels
# --------------------------------------------------------------------------- #
def _ln_kernel(x_ref, o_ref, *, eps):
    # Identity-affine LayerNorm, single pass over x: mean and E[x^2] together.
    x = x_ref[...].astype(jnp.float32)
    mean = jnp.mean(x, axis=-1, keepdims=True)
    m2 = jnp.mean(x * x, axis=-1, keepdims=True)
    inv = jax.lax.rsqrt(m2 - mean * mean + eps)        # EUP rsqrt (biased var, like nn.LayerNorm)
    o_ref[...] = ((x - mean) * inv).astype(o_ref.dtype)


def _ln_affine_kernel(x_ref, g_ref, b_ref, o_ref, *, eps):
    # Same, with trained gamma/beta plumbed through.
    x = x_ref[...].astype(jnp.float32)
    mean = jnp.mean(x, axis=-1, keepdims=True)
    m2 = jnp.mean(x * x, axis=-1, keepdims=True)
    inv = jax.lax.rsqrt(m2 - mean * mean + eps)
    g = g_ref[...].astype(jnp.float32)                 # (1, dim) broadcasts over rows
    b = b_ref[...].astype(jnp.float32)
    o_ref[...] = ((x - mean) * inv * g + b).astype(o_ref.dtype)


def _ln_matmul_kernel(x_ref, w_ref, o_ref, xn_ref, *, eps):
    # Fused LayerNorm + GEMM.  grid = (row tiles, out-col tiles); LN runs once
    # per row tile (j == 0), the normalized block is kept in VMEM scratch and
    # reused for every output-column tile -- no HBM round trip for LN(x).
    @pl.when(pl.program_id(1) == 0)
    def _():
        x = x_ref[...].astype(jnp.float32)
        mean = jnp.mean(x, axis=-1, keepdims=True)
        m2 = jnp.mean(x * x, axis=-1, keepdims=True)
        inv = jax.lax.rsqrt(m2 - mean * mean + eps)
        xn_ref[...] = ((x - mean) * inv).astype(xn_ref.dtype)
    o_ref[...] = jnp.dot(xn_ref[...], w_ref[...],
                         preferred_element_type=jnp.float32).astype(o_ref.dtype)


# --------------------------------------------------------------------------- #
# Wrappers
# --------------------------------------------------------------------------- #
def layer_norm_pallas(x: jax.Array, gamma=None, beta=None, eps: float = 1e-5) -> jax.Array:
    """LayerNorm over the last axis of `x`.  gamma/beta of None == the
    nn.LayerNorm defaults (ones/zeros); their DMAs and multiply-add are then
    dropped entirely."""
    *lead, dim = x.shape
    rows = math.prod(lead) if lead else 1
    x2 = x.reshape(rows, dim)                 # contiguous reshape: no HBM copy

    itemsize = jnp.dtype(x.dtype).itemsize
    sub = _sublane(x.dtype)
    tile_rows = _pick_row_tile(rows, dim, itemsize, sub, max_tile_bytes=3 * 1024 * 1024)
    grid = (pl.cdiv(rows, tile_rows),)

    row_spec = pl.BlockSpec((tile_rows, dim), lambda i: (i, 0))
    compiler_params = pltpu.CompilerParams(
        dimension_semantics=("parallel",),
        vmem_limit_bytes=_VMEM_LIMIT_BYTES,
    )

    if gamma is None and beta is None:
        out2 = pl.pallas_call(
            functools.partial(_ln_kernel, eps=eps),
            out_shape=jax.ShapeDtypeStruct((rows, dim), x.dtype),
            grid=grid,
            in_specs=[row_spec],
            out_specs=row_spec,
            compiler_params=compiler_params,
        )(x2)
    else:
        g = jnp.ones((dim,), x.dtype) if gamma is None else jnp.asarray(gamma)
        b = jnp.zeros((dim,), x.dtype) if beta is None else jnp.asarray(beta)
        vec_spec = pl.BlockSpec((1, dim), lambda i: (0, 0))
        out2 = pl.pallas_call(
            functools.partial(_ln_affine_kernel, eps=eps),
            out_shape=jax.ShapeDtypeStruct((rows, dim), x.dtype),
            grid=grid,
            in_specs=[row_spec, vec_spec, vec_spec],
            out_specs=row_spec,
            compiler_params=compiler_params,
        )(x2, g.reshape(1, dim), b.reshape(1, dim))

    return out2.reshape(x.shape)


def layer_norm_linear_pallas(x: jax.Array, w: jax.Array, eps: float = 1e-5) -> jax.Array:
    """Fused LayerNorm(x) @ w (identity LN affine, bias-free projection)."""
    *lead, dim = x.shape
    rows = math.prod(lead) if lead else 1
    assert w.shape[0] == dim, "weight must be (dim, out_dim)"
    n = w.shape[1]
    x2 = x.reshape(rows, dim)

    itemsize = jnp.dtype(x.dtype).itemsize
    sub = _sublane(x.dtype)
    tile_rows = _pick_row_tile(rows, dim, itemsize, sub, max_tile_bytes=2 * 1024 * 1024)
    tile_n = n if n <= 512 else 512          # 512 is a multiple of 128 -> legal partial tiles
    grid = (pl.cdiv(rows, tile_rows), pl.cdiv(n, tile_n))

    out2 = pl.pallas_call(
        functools.partial(_ln_matmul_kernel, eps=eps),
        out_shape=jax.ShapeDtypeStruct((rows, n), x.dtype),
        grid=grid,
        in_specs=[
            pl.BlockSpec((tile_rows, dim), lambda i, j: (i, 0)),
            pl.BlockSpec((dim, tile_n), lambda i, j: (0, j)),
        ],
        out_specs=pl.BlockSpec((tile_rows, tile_n), lambda i, j: (i, j)),
        scratch_shapes=[pltpu.VMEM((tile_rows, dim), x.dtype)],
        compiler_params=pltpu.CompilerParams(
            dimension_semantics=("parallel", "arbitrary"),
            vmem_limit_bytes=_VMEM_LIMIT_BYTES,
        ),
    )(x2, w)

    return out2.reshape(tuple(lead) + (n,))


# --------------------------------------------------------------------------- #
# Module mirrors
# --------------------------------------------------------------------------- #
class Linear:
    """Minimal bias-free linear layer used as the wrapped sub-module `fn`.
    When PreNorm (with default LN affine) wraps one of these, the forward pass
    uses the fused LN+GEMM kernel."""

    def __init__(self, weight: jax.Array):
        self.weight = weight                           # (in_dim, out_dim)

    def __call__(self, x):
        return jnp.dot(x, self.weight,
                       preferred_element_type=jnp.float32).astype(x.dtype)


class PreNorm:
    """JAX/Pallas mirror of the PyTorch PreNorm: y = fn(LayerNorm(x), *args, **kwargs)."""

    def __init__(self, dim, fn, norm_type: str = "ln"):
        # `norm_type` is accepted but ignored, matching the reference module
        # (it always builds nn.LayerNorm(dim)).
        self.dim = dim
        self.fn = fn
        self.eps = 1e-5
        self.gamma = None          # None == nn.LayerNorm default weight (ones)
        self.beta = None           # None == nn.LayerNorm default bias  (zeros)

    def load_norm_weights(self, gamma, beta):
        """Plumb trained nn.LayerNorm weights through to the kernels."""
        self.gamma = jnp.asarray(gamma)
        self.beta = jnp.asarray(beta)

    def __call__(self, x, *args, **kwargs):
        return self.forward(x, *args, **kwargs)

    def forward(self, x, *args, **kwargs):
        affine_is_default = self.gamma is None and self.beta is None
        if affine_is_default and isinstance(self.fn, Linear) and not args and not kwargs:
            # Structural fusion: LN + the first GEMM of `fn`, one kernel, no
            # HBM writeback/re-read of the normalized activation.
            return layer_norm_linear_pallas(x, self.fn.weight, eps=self.eps)
        x = layer_norm_pallas(x, self.gamma, self.beta, self.eps)
        # TODO(synk): `fn` is an arbitrary user-supplied sub-module (attention /
        # feed-forward in the reference network); it runs as plain JAX here.
        return self.fn(x, *args, **kwargs)


# --------------------------------------------------------------------------- #
# Reference + demo
# --------------------------------------------------------------------------- #
def _layer_norm_ref(x, gamma, beta, eps):
    xf = x.astype(jnp.float32)
    mean = jnp.mean(xf, axis=-1, keepdims=True)
    var = jnp.mean((xf - mean) ** 2, axis=-1, keepdims=True)
    y = (xf - mean) * jax.lax.rsqrt(var + eps)
    if gamma is not None:
        y = y * gamma
    if beta is not None:
        y = y + beta
    return y.astype(x.dtype)


if __name__ == "__main__":
    key = jax.random.PRNGKey(0)
    k_x, k_w, k_g, k_b = jax.random.split(key, 4)

    # Transformer-style input (batch, seq, hidden); hidden kept a multiple of
    # 128 so loads / stores stay lane-dense.
    B, S, D = 2, 8, 128
    x = jax.random.normal(k_x, (B, S, D), dtype=jnp.float32)
    w = jax.random.normal(k_w, (D, D), dtype=jnp.float32) / math.sqrt(D)

    # 1) Fused path: PreNorm wrapping a bias-free Linear -> LN + GEMM, one kernel.
    pre = PreNorm(D, Linear(w))
    y = jax.block_until_ready(pre(x))
    y_ref = jnp.dot(_layer_norm_ref(x, None, None, pre.eps), w,
                    preferred_element_type=jnp.float32)
    assert y.shape == (B, S, D) and y.dtype == x.dtype
    assert bool(jnp.allclose(y, y_ref, atol=2e-4, rtol=2e-4)), "fused PreNorm mismatch"

    # 2) Generic path: standalone LayerNorm kernel (default identity affine).
    ln = jax.block_until_ready(layer_norm_pallas(x))
    ln_ref = _layer_norm_ref(x, None, None, 1e-5)
    assert bool(jnp.allclose(ln, ln_ref, atol=1e-5, rtol=1e-5)), "LayerNorm mismatch"

    # 3) Trained (non-default) affine plumbed through the affine kernel.
    gamma = 1.0 + 0.1 * jax.random.normal(k_g, (D,), dtype=jnp.float32)
    beta = 0.1 * jax.random.normal(k_b, (D,), dtype=jnp.float32)
    ln_aff = jax.block_until_ready(layer_norm_pallas(x, gamma, beta))
    ln_aff_ref = _layer_norm_ref(x, gamma, beta, 1e-5)
    assert bool(jnp.allclose(ln_aff, ln_aff_ref, atol=1e-5, rtol=1e-5)), "affine LN mismatch"

    print("KERNEL_OK")
</pallas_src>

<mosaic_0001>
module attributes {stable_mosaic.version = 11 : i64} {
  func.func @_ln_matmul_kernel(%arg0: i32, %arg1: i32, %arg2: memref<8x128xf32, #tpu.memory_space<vmem>>, %arg3: memref<128x128xf32, #tpu.memory_space<vmem>>, %arg4: memref<8x128xf32, #tpu.memory_space<vmem>>, %arg5: memref<8x128xf32, #tpu.memory_space<vmem>>) attributes {dimension_semantics = [#tpu.dimension_semantics<parallel>, #tpu.dimension_semantics<arbitrary>], iteration_bounds = array<i64: 2, 1>, scalar_prefetch = 0 : i64, scratch_operands = 1 : i64, tpu.core_type = #tpu.core_type<tc>, window_params = [{transform_indices = @transform_0, window_bounds = array<i64: 8, 128>}, {transform_indices = @transform_1, window_bounds = array<i64: 128, 128>}, {transform_indices = @transform_2, window_bounds = array<i64: 8, 128>}]} {
    %c0_i32 = arith.constant 0 : i32
    %0 = arith.cmpi eq, %arg1, %c0_i32 : i32
    %1 = arith.extui %0 : i1 to i32
    %c0_i32_0 = arith.constant 0 : i32
    %2 = arith.cmpi ne, %1, %c0_i32_0 : i32
    scf.if %2 {
      %c0_6 = arith.constant 0 : index
      %c0_7 = arith.constant 0 : index
      %7 = vector.load %arg2[%c0_6, %c0_7] : memref<8x128xf32, #tpu.memory_space<vmem>>, vector<8x128xf32>
      %cst_8 = arith.constant dense<0.000000e+00> : vector<8xf32>
      %8 = vector.multi_reduction <add>, %7, %cst_8 [1] : vector<8x128xf32> to vector<8xf32>
      %9 = vector.shape_cast %8 : vector<8xf32> to vector<8x1xf32>
      %cst_9 = arith.constant 1.280000e+02 : f32
      %10 = vector.broadcast %cst_9 : f32 to vector<8x1xf32>
      %11 = arith.divf %9, %10 : vector<8x1xf32>
      %12 = arith.mulf %7, %7 : vector<8x128xf32>
      %cst_10 = arith.constant dense<0.000000e+00> : vector<8xf32>
      %13 = vector.multi_reduction <add>, %12, %cst_10 [1] : vector<8x128xf32> to vector<8xf32>
      %14 = vector.shape_cast %13 : vector<8xf32> to vector<8x1xf32>
      %cst_11 = arith.constant 1.280000e+02 : f32
      %15 = vector.broadcast %cst_11 : f32 to vector<8x1xf32>
      %16 = arith.divf %14, %15 : vector<8x1xf32>
      %17 = arith.mulf %11, %11 : vector<8x1xf32>
      %18 = arith.subf %16, %17 : vector<8x1xf32>
      %cst_12 = arith.constant 9.99999974E-6 : f32
      %19 = vector.broadcast %cst_12 : f32 to vector<8x1xf32>
      %20 = arith.addf %18, %19 : vector<8x1xf32>
      %21 = math.rsqrt %20 : vector<8x1xf32>
      %22 = vector.broadcast %11 : vector<8x1xf32> to vector<8x128xf32>
      %23 = arith.subf %7, %22 : vector<8x128xf32>
      %24 = vector.broadcast %21 : vector<8x1xf32> to vector<8x128xf32>
      %25 = arith.mulf %23, %24 : vector<8x128xf32>
      %c0_13 = arith.constant 0 : index
      %c0_14 = arith.constant 0 : index
      %26 = vector.load %arg5[%c0_13, %c0_14] : memref<8x128xf32, #tpu.memory_space<vmem>>, vector<8x128xf32>
      tpu.vector_store %arg5[%c0_13, %c0_14], %25 {strides = array<i32>} : memref<8x128xf32, #tpu.memory_space<vmem>>, vector<8x128xf32>,
    } else {
    }
    %c0 = arith.constant 0 : index
    %c0_1 = arith.constant 0 : index
    %3 = vector.load %arg5[%c0, %c0_1] : memref<8x128xf32, #tpu.memory_space<vmem>>, vector<8x128xf32>
    %c0_2 = arith.constant 0 : index
    %c0_3 = arith.constant 0 : index
    %4 = vector.load %arg3[%c0_2, %c0_3] : memref<128x128xf32, #tpu.memory_space<vmem>>, vector<128x128xf32>
    %cst = arith.constant dense<0.000000e+00> : vector<8x128xf32>
    %5 = tpu.matmul %3, %4, %cst {dimension_numbers = #tpu.dot_dimension_numbers<[1], [0], [0], [1], [0, 0, 1, 1], [], []>} : vector<8x128xf32>, vector<128x128xf32>, vector<8x128xf32> -> vector<8x128xf32>
    %c0_4 = arith.constant 0 : index
    %c0_5 = arith.constant 0 : index
    %6 = vector.load %arg4[%c0_4, %c0_5] : memref<8x128xf32, #tpu.memory_space<vmem>>, vector<8x128xf32>
    tpu.vector_store %arg4[%c0_4, %c0_5], %5 {strides = array<i32>} : memref<8x128xf32, #tpu.memory_space<vmem>>, vector<8x128xf32>,
    return
  }
  func.func @transform_0(%arg0: i32, %arg1: i32) -> (i32, i32) {
    %c0_i32 = arith.constant 0 : i32
    %c0_i32_0 = arith.constant 0 : i32
    return %arg0, %c0_i32 : i32, i32
  }
  func.func @transform_1(%arg0: i32, %arg1: i32) -> (i32, i32) {
    %c0_i32 = arith.constant 0 : i32
    %c0_i32_0 = arith.constant 0 : i32
    return %c0_i32, %arg1 : i32, i32
  }
  func.func @transform_2(%arg0: i32, %arg1: i32) -> (i32, i32) {
    %c0_i32 = arith.constant 0 : i32
    return %arg0, %arg1 : i32, i32
  }
}

</mosaic_0001>

<bundles_post_ra>
// kernel: tpu_custom_call.1
= control target key start
LH: loop header
LB: loop body
LE: loop exit
PB: predicated region body
PF: predicated region fallthrough
CT: control target
= control target key end

     0   :  { %7 = vsyncpa [#allocation4], 0  ;;  %s906_s0 = inlined_call_operand.hbm [shape: f32[16,128], index: 0, kind: input, shape index: {}]   ;;  %s907_s1 = inlined_call_operand.hbm [shape: f32[128,128], index: 1, kind: input, shape index: {}]   ;;  %s908_s2 = inlined_call_operand.hbm [shape: f32[16,128], index: 2, kind: output, shape index: {}]  }
   0x1   :  { %9 = vsyncpa [#allocation4 + $0x1], 0 }
   0x2   :  { %10 = vsyncpa [#allocation7], 0 }
   0x3   :  { %11 = vsyncpa [#allocation5], 0 }
   0x4   :  { %13 = vsyncpa [#allocation5 + $0x1], 0  ;;  %s717_s9 = smov 0   ;;  %s719_s10 = smov 0  }
   0x5   :  { %s721_s11 = smov 0   ;;  %s723_s12 = smov 0  }
   0x6   :  { %s725_s13 = smov 0   ;;  %s727_s14 = smov 0  }
   0x7 LB: > { %s409_s15 = sadd.s32 4294967295, %s693_s14   ;;  %s410_s16 = sadd.s32 4294967294, %s693_s14   ;;  %s693_s14 = sphi %s727_s14, %s19_s14   ;;  %s689_s13 = sphi %s725_s13, %s926_s13   ;;  %s685_s12 = sphi %s723_s12, %s925_s12   ;;  %s681_s11 = sphi %s721_s11, %s924_s11   ;;  %s677_s10 = sphi %s719_s10, %s923_s10   ;;  %s673_s9 = sphi %s717_s9, %s922_s9  }
   0x8   : > { %p51_p0 = scmp.ne.s32.totalorder %s677_s10, %s673_s9  ;;  %p751_p1 = scmp.eq.s32.totalorder %s409_s15, 0 }
   0x9   : > { %p755_p2 = scmp.eq.s32.totalorder %s409_s15, 1  ;;  %p109_p3 = scmp.eq.s32.totalorder %s410_s16, 1 }
   0xa   : > { %p761_p4 = por %p751_p1, %p51_p0  ;;  %p411_p5 = scmp.ge.s32.totalorder %s693_s14, 1 }
   0xb   : > { %p766_p6 = por %p109_p3, %p51_p0  ;;  %p116_p7 = scmp.lt.s32.totalorder %s693_s14, 3 }
   0xc   : > { %s912_s19 = scalar_select %p761_p4, 1, 0 }
   0xd   : > { %s913_s20 = scalar_select %p766_p6, 1, 0 }
   0xe   : > { %p771_p8 = pnand %p411_p5, %p116_p7  ;;  %s695_s22 = smov [#allocation6]  }
   0xf   : > { %s130_s23 = sshll.u32 %s695_s22, 4  ;;  %s31_s25 = sadd.s32 1, %s689_s13  ;;  %s131_s23 = int_to_ptr.vmem [resolvable:$true] %s130_s23 }
  0x10   : > { %p484_p9 = pneg %p771_p8  ;;  %s566_s26 = scalar_lea.vmem %s131_s23, 2048 }
  0x11   : > { %p567_p13 = scmp.ne.s32.totalorder %s131_s23, %s566_s26  ;;  %p574_p5 = scmp.lt.s32.totalorder %s131_s23, %s131_s23 }
  0x12   : > { %p780_p11 = pnand %p484_p9, %p751_p1  ;;  %p575_p7 = scmp.lt.s32.totalorder %s566_s26, %s566_s26 }
  0x14   : > { %p557_p12 = pneg %p780_p11  ;;  %p576_p6 = por %p575_p7, %p574_p5 }
  0x16   : > { %p569_p0 = pnand %p567_p13, %p557_p12 }
  0x18   : > { %p570_p3 = pneg %p569_p0 }
  0x1a   : > { %p577_p4 = pnand %p576_p6, %p570_p3 }
  0x1c   : > { %580 = shalt.err (!%p577_p4)
}
  0x1d   : > { %s696_s27 = smov 128   ;;  %s697_s28 = smov 8  }
  0x1e   : > { %487 = dma.hbm_to_vmem [thread:$0]  (!%p780_p11), %s907_s1, 2048, %s131_s23, [#allocation7], %s696_s27, %s696_s27, %s697_s28  }
  0x1f   : > { %p33_p6 = scmp.ge.s32.totalorder %s31_s25, 2  ;;  %s38_s3 = sadd.s32 1, %s681_s11 }
  0x20   : > { %p45_p4 = scmp.ne.s32.totalorder %s681_s11, %s677_s10  ;;  %p46_p9 = scmp.eq.s32.totalorder %s693_s14, 0 }
  0x21   : > { %s928_s25 = smov (%p33_p6, %s31_s25), 0  ;;  %p497_p0 = scmp.lt.s32.totalorder %s693_s14, 2 }
  0x22   : > { %p798_p12 = por %p46_p9, %p45_p4  ;;  %p804_p13 = por %p755_p2, %p45_p4 }
  0x23   : > { %s35_s6 = ssub.s32 %s689_s13, %s928_s25  ;;  %s144_s7 = sand.u32 1, %s681_s11  }
  0x24   : > { %p36_p11 = scmp.eq.s32.totalorder %s35_s6, 0  ;;  %s414_s8 = sshll.u32 %s144_s7, 3 }
  0x25   : > { %s415_s16 = sshll.u32 %s689_s13, 7  ;;  %s148_s26 = scalar_lea.vmem [#allocation3], %s414_s8 }
  0x26   : > { %s813_s15 = scalar_select %p36_p11, %s681_s11, %s38_s3  }
  0x27   : > { %s153_s24 = scalar_lea.hbm %s906_s0, %s415_s16  ;;  %s155_s27 = sshll.u32 %s148_s26, 4  ;;  %s156_s27 = int_to_ptr.vmem [resolvable:$true] %s155_s27 }
  0x28   : > { %p821_p2 = pnand %p497_p0, %p798_p12  ;;  %s145_s28 = scalar_lea.sflag [#allocation4], %s144_s7 }
  0x29   : > { %s594_s29 = scalar_lea.vmem %s156_s27, 128  ;;  %s698_s30 = smov [#allocation3]  }
  0x2a   : > { %p583_p3 = pneg %p821_p2  ;;  %p595_p5 = scmp.ne.s32.totalorder %s156_s27, %s594_s29 }
  0x2b   : > { %s599_s3 = sshll.u32 %s698_s30, 4  ;;  %s600_s3 = int_to_ptr.vmem [resolvable:$false] %s599_s3 }
  0x2c   : > { %p597_p7 = pnand %p595_p5, %p583_p3  ;;  %s601_s6 = scalar_lea.vmem %s600_s3, 256 }
  0x2d   : > { %p602_p4 = scmp.lt.s32.totalorder %s156_s27, %s600_s3  ;;  %p603_p9 = scmp.lt.s32.totalorder %s601_s6, %s594_s29 }
  0x2e   : > { %p598_p6 = pneg %p597_p7 }
  0x2f   : > { %p604_p11 = por %p603_p9, %p602_p4 }
  0x31   : > { %p605_p10 = pnand %p604_p11, %p598_p6 }
  0x33   : > { %608 = shalt.err (!%p605_p10)
}
  0x34   : > { %491 = dma.hbm_to_vmem [thread:$0]  (!%p821_p2), %s153_s24, 128, %s156_s27, %s145_s28  }
  0x35   : > { %164 = sbr.rel (%p771_p8) target bundleno = 433 (0x1b1), region = 28  ;;  %s832_s4 = sand.u32 (!%p771_p8), 1, %s677_s10  }
  0x36   : > { %s417_s7 = sshll.u32 (!%p771_p8), %s832_s4, 3  ;;  %s167_s8 = scalar_lea.sflag (!%p771_p8), [#allocation4], %s832_s4 }
  0x37   : > { %s170_s16 = scalar_lea.vmem (!%p771_p8), [#allocation3], %s417_s7  ;;  %p919_p12 = scmp.ne.s32.totalorder (!%p771_p8), %s912_s19, 0 }
  0x3a   : > { %660 = dma.done.wait (%p919_p12), %s167_s8, 128  }
  0x3b   : > { %662 = vsyncadd (%p919_p12), %s167_s8, 4294967168 }
  0x3c   : > { %664 = dma.done.wait (%p751_p1), [#allocation7], 2048  }
  0x3d   : > { %666 = vsyncadd (%p751_p1), [#allocation7], 4294965248  ;;  %v699_v0 = vmov 0.0   ;;  %v846_v1 = vld [vmem:[%s170_s16] sm:$0xff]  ;;  %v229_v5 = vld [vmem:[#allocation6 + $0x68] sm:$0xff]  ;;  %vm700_vm0 = vmmov 0  }
  0x3e   : > { %441 = vmatprep.subr.mxu0 %v699_v0  ;;  %v231_v2 = vld [vmem:[#allocation6 + $0x78] sm:$0xff]  ;;  %v230_v3 = vld [vmem:[#allocation6 + $0x70] sm:$0xff]  ;;  %200 = vadd.xlane.f32.xlu0 %v846_v1  ;;  %v204_v4 = vmul.f32 %v846_v1, %v846_v1  ;;  %v228_v6 = vld [vmem:[#allocation6 + $0x60] sm:$0xff]  ;;  %s194_s17 = scalar_lea.vmem [#allocation8], %s417_s7  ;;  %s421_s21 = sshll.u32 %s685_s12, 7 }
  0x3f   : > { %442 = vmatpush3.msra.mxu0 %v231_v2  ;;  %v227_v7 = vld [vmem:[#allocation6 + $0x58] sm:$0xff]  ;;  %v226_v8 = vld [vmem:[#allocation6 + $0x50] sm:$0xff]  ;;  %v225_v9 = vld [vmem:[#allocation6 + $0x48] sm:$0xff]  ;;  %473 = vmatprep.mubr.msk.f32.mxu0 %vm700_vm0, %v699_v0  ;;  %s318_s19 = sshll.u32 %s194_s17, 4  ;;  %s860_s24 = scalar_lea.hbm %s908_s2, %s421_s21  ;;  %s855_s19 = int_to_ptr.vmem [resolvable:$true] %s318_s19 }
  0x40   : > { %443 = vmatprep.subr.mxu0 %v699_v0  ;;  %v224_v10 = vld [vmem:[#allocation6 + $0x40] sm:$0xff]  ;;  %v223_v11 = vld [vmem:[#allocation6 + $0x38] sm:$0xff]  ;;  %v222_v12 = vld [vmem:[#allocation6 + $0x30] sm:$0xff]  ;;  %s304_s26 = scalar_lea.sflag [#allocation5], %s832_s4  ;;  %s609_s27 = scalar_lea.vmem %s855_s19, 128 }
  0x41   : > { %444 = vmatpush3.msra.mxu0 %v230_v3  ;;  %v221_v13 = vld [vmem:[#allocation6 + $0x28] sm:$0xff]  ;;  %v220_v14 = vld [vmem:[#allocation6 + $0x20] sm:$0xff]  ;;  %v219_v15 = vld [vmem:[#allocation6 + $0x18] sm:$0xff]  ;;  %p610_p1 = scmp.ne.s32.totalorder %s855_s19, %s609_s27  ;;  %s701_s12 = smov [#allocation8]  }
  0x42   : > { %445 = vmatprep.subr.mxu0 %v699_v0  ;;  %205 = vadd.xlane.f32.xlu0 %v204_v4  ;;  %v218_v16 = vld [vmem:[#allocation6 + $0x10] sm:$0xff]  ;;  %v217_v17 = vld [vmem:[#allocation6 + $0x8] sm:$0xff]  ;;  %v216_v18 = vld [vmem:[#allocation6] sm:$0xff]  ;;  %s613_s18 = sshll.u32 %s701_s12, 4  ;;  %s614_s18 = int_to_ptr.vmem [resolvable:$false] %s613_s18 }
  0x43   : > { %446 = vmatpush3.msra.mxu0 %v229_v5  ;;  %p611_p8 = pnand %p610_p1, %p804_p13  ;;  %s615_s28 = scalar_lea.vmem %s614_s18, 256 }
  0x44   : > { %447 = vmatprep.subr.mxu0 %v699_v0  ;;  %p616_p0 = scmp.lt.s32.totalorder %s855_s19, %s614_s18  ;;  %p617_p2 = scmp.lt.s32.totalorder %s615_s28, %s609_s27 }
  0x45   : > { %448 = vmatpush3.msra.mxu0 %v228_v6  ;;  %p612_p10 = pneg %p611_p8 }
  0x46   : > { %449 = vmatprep.subr.mxu0 %v699_v0  ;;  %p618_p3 = por %p617_p2, %p616_p0 }
  0x47   : > { %450 = vmatpush3.msra.mxu0 %v227_v7 }
  0x48   : > { %451 = vmatprep.subr.mxu0 %v699_v0  ;;  %p619_p5 = pnand %p618_p3, %p612_p10 }
  0x49   : > { %452 = vmatpush3.msra.mxu0 %v226_v8 }
  0x4a   : > { %453 = vmatprep.subr.mxu0 %v699_v0 }
  0x4b   : > { %454 = vmatpush3.msra.mxu0 %v225_v9 }
  0x4c   : > { %455 = vmatprep.subr.mxu0 %v699_v0 }
  0x4d   : > { %456 = vmatpush3.msra.mxu0 %v224_v10 }
  0x4e   : > { %457 = vmatprep.subr.mxu0 %v699_v0 }
  0x4f   : > { %458 = vmatpush3.msra.mxu0 %v223_v11 }
  0x50   : > { %459 = vmatprep.subr.mxu0 %v699_v0 }
  0x51   : > { %460 = vmatpush3.msra.mxu0 %v222_v12 }
  0x52   : > { %461 = vmatprep.subr.mxu0 %v699_v0 }
  0x53   : > { %462 = vmatpush3.msra.mxu0 %v221_v13 }
  0x54   : > { %463 = vmatprep.subr.mxu0 %v699_v0 }
  0x55   : > { %464 = vmatpush3.msra.mxu0 %v220_v14 }
  0x56   : > { %465 = vmatprep.subr.mxu0 %v699_v0 }
  0x57   : > { %466 = vmatpush3.msra.mxu0 %v219_v15 }
  0x58   : > { %467 = vmatprep.subr.mxu0 %v699_v0 }
  0x59   : > { %468 = vmatpush3.msra.mxu0 %v218_v16 }
  0x5a   : > { %469 = vmatprep.subr.mxu0 %v699_v0 }
  0x5b   : > { %470 = vmatpush3.msra.mxu0 %v217_v17 }
  0x5c   : > { %471 = vmatprep.subr.mxu0 %v699_v0 }
  0x5d   : > { %472 = vmatpush3.msra.mxu0 %v216_v18 }
  0xc7   : > { %v201_v19 = vpop.xlane.xlu0 %200 }
  0xc8   : > { %v203_v20 = vmul.f32 0.0078125, %v201_v19 }
  0xca   : > { %v208_v22 = vmul.f32 %v203_v20, %v203_v20  ;;  %v212_v26 = vsub.f32 %v846_v1, %v203_v20 }
  0xcb   : > { %v206_v21 = vpop.xlane.xlu0 %205 }
  0xcc   : > { %v207_v23 = vmul.f32 0.0078125, %v206_v21 }
  0xce   : > { %v209_v24 = vsub.f32 %v207_v23, %v208_v22 }
  0xd0   : > { %v210_v25 = vadd.f32 1e-05, %v209_v24 }
  0xd2   : > { %553 = vrsqrt.f32 %v210_v25 }
  0xdf   : > { %v554_v27 = vpop.eup %553 }
  0xe0   : > { %v213_v28 = vmul.f32 %v554_v27, %v212_v26 }
  0xe2   : > { %474 = vmatmul.mubr.f32.vlgmr.msra.gmra.mxu0 %v213_v28 }
 0x1a2   : > { %v298_v29 = vpop.f32.mrf.mxu0 }
 0x1a3   : > { %302 = vst [vmem:[%s194_s17] sm:$0xff] %v298_v29 }
 0x1a4   : > { %v475_v30 = vpop.f32.mrf.mxu0 }
 0x1a5   : > { %622 = shalt.err (!%p619_p5)
}
 0x1a6   : > { %s623_s29 = scalar_lea.hbm %s860_s24, 128  ;;  %s627_s6 = scalar_lea.hbm %s908_s2, 256 }
 0x1a7   : > { %p624_p7 = scmp.ne.s32.totalorder %s860_s24, %s623_s29  ;;  %p628_p9 = scmp.lt.s32.totalorder %s860_s24, %s908_s2 }
 0x1a8   : > { %p629_p11 = scmp.lt.s32.totalorder %s627_s6, %s623_s29 }
 0x1a9   : > { %p625_p6 = pnand %p624_p7, %p804_p13 }
 0x1aa   : > { %p630_p12 = por %p629_p11, %p628_p9 }
 0x1ab   : > { %p626_p4 = pneg %p625_p6 }
 0x1ad   : > { %p631_p1 = pnand %p630_p12, %p626_p4 }
 0x1af   : > { %634 = shalt.err (!%p631_p1)
}
 0x1b0   : > { %482 = dma.vmem_to_hbm [thread:$0]  (%p804_p13), %s855_s19, 128, %s860_s24, %s304_s26  }
 0x1b1 PF: > { %s330_s8 = sand.u32 1, %s673_s9   ;;  %p920_p8 = scmp.ne.s32.totalorder %s913_s20, 0 }
 0x1b2   : > { %p921_p10 = scmp.ge.s32.totalorder %s693_s14, 2  ;;  %s331_s16 = scalar_lea.sflag [#allocation5], %s330_s8 }
 0x1b4   : > { %p493_p0 = pnand %p921_p10, %p920_p8 }
 0x1b6   : > { %p494_p2 = pneg %p493_p0 }
 0x1b8   : > { %668 = dma.done.wait (%p494_p2), %s331_s16, 128  }
 0x1b9   : > { %670 = vsyncadd (%p494_p2), %s331_s16, 4294967168  ;;  %s19_s14 = sadd.s32 1, %s693_s14   ;;  %s922_s9 = smov %s677_s10 }
 0x1ba   : > { %p16_p3 = scmp.ge.s32.totalorder %s19_s14, 4   ;;  %s923_s10 = smov %s681_s11 }
 0x1bb   : > { %s924_s11 = smov %s813_s15  ;;  %s925_s12 = smov %s689_s13 }
 0x1bc   : > { %s926_s13 = smov %s928_s25  ;;  %18 = sbr.rel (!%p16_p3) target bundleno = 7 (0x7), region = 82 }
 0x1c1   :  { %336 = vsyncpa [#allocation4], 1 }
 0x1c2   :  { %338 = vsyncpa [#allocation4 + $0x1], 1 }
 0x1c3   :  { %339 = vsyncpa [#allocation7], 1 }
 0x1c4   :  { %340 = vsyncpa [#allocation5], 1 }
 0x1c5   :  { %342 = vsyncpa [#allocation5 + $0x1], 1 }

</bundles_post_ra>
